<compile_context>
chip_gen: v7x
topology: tpu7x:2x2x1
jax: 0.10.0
libtpu: 0.0.40
codegen_flags: <defaults>
</compile_context>

<pallas_src>
import functools

import jax
import jax.numpy as jnp
from jax.experimental import pallas as pl
from jax.experimental.pallas import tpu as pltpu

_LANE = 128          # TPU lane width
_ROWS_MAX = 2048     # rows of 128 lanes per channel per grid step
_NEG_FILL = -100.0   # pad logit: sigmoid(-100) == 0, bce(-100, 0) == 0 in f32
_C_USED = 3          # WT, TC, ET
_DICE_SMOOTH = 1e-5


def _bce_dice_stats_kernel(p_ref, y_ref, out_ref, acc_ref, *,
                           rows_total, rows_blk, needs_row_mask):
    """Accumulate per-channel [intersection, sum(sig p), sum(y), sum(bce)]."""
    n = pl.program_id(1)
    t = pl.program_id(2)

    @pl.when((n == 0) & (t == 0))
    def _():
        acc_ref[...] = jnp.zeros_like(acc_ref)

    p = p_ref[0].astype(jnp.float32)   # (C_USED, rows_blk, 128) logits
    y = y_ref[0].astype(jnp.float32)   # (C_USED, rows_blk, 128) binary targets

    if needs_row_mask:
        # Rare ragged tail along the row axis (only when rows_total > _ROWS_MAX
        # and no clean divisor exists): neutralize stale VMEM rows.
        row = jax.lax.broadcasted_iota(jnp.int32, p.shape, 1) + t * rows_blk
        valid = row < rows_total
        p = jnp.where(valid, p, _NEG_FILL)
        y = jnp.where(valid, y, 0.0)

    # sigmoid + stable BCE-with-logits from one tanh + one log (2 EUP ops/elem).
    th = jnp.tanh(0.5 * p)
    sp = 0.5 + 0.5 * th                                          # sigmoid(p)
    bce = jnp.maximum(p, 0.0) - p * y - jnp.log(0.5 + 0.5 * jnp.abs(th))

    # Per-stat slice accumulation (no concatenate, no narrow HBM stores).
    acc_ref[0] += jnp.sum(sp * y, axis=1)    # intersection   (C_USED, 128)
    acc_ref[1] += jnp.sum(sp, axis=1)        # sum sigmoid(p)
    acc_ref[2] += jnp.sum(y, axis=1)         # sum y
    acc_ref[3] += jnp.sum(bce, axis=1)       # sum bce

    # Single lane-dense write of this split's stats in the epilogue.
    @pl.when((n == pl.num_programs(1) - 1) & (t == pl.num_programs(2) - 1))
    def _():
        out_ref[0] = acc_ref[...]


def bce_dice_loss(p, y):
    """p, y: (N, C, H, W); only channels 0..2 (WT, TC, ET) are used. Scalar loss."""
    N, C, H, W = p.shape
    assert C >= _C_USED, "BCEDiceLoss uses channels 0, 1, 2 (WT, TC, ET)"
    L = H * W
    M = N * L  # per-channel BCEWithLogitsLoss mean denominator

    Lp = ((L + _LANE - 1) // _LANE) * _LANE
    if Lp != L:
        # TODO(synk): this pad is a full extra HBM read+write of both tensors;
        # it only triggers when H*W is not a multiple of 128 (rare for typical
        # image sizes). Replace with an in-kernel lane mask if it ever matters.
        p = jnp.pad(p.reshape(N, C, L), ((0, 0), (0, 0), (0, Lp - L)),
                    constant_values=_NEG_FILL)
        y = jnp.pad(y.reshape(N, C, L), ((0, 0), (0, 0), (0, Lp - L)),
                    constant_values=0)
    rows_total = Lp // _LANE

    # Free, contiguous reshapes only (no transpose).
    p4 = p.reshape(N, C, rows_total, _LANE)
    y4 = y.reshape(N, C, rows_total, _LANE)

    # Row tiling: biggest tile <= _ROWS_MAX; prefer an exact divisor (multiple
    # of 8) of rows_total so no row mask is needed.
    if rows_total <= _ROWS_MAX:
        rows_blk = rows_total
    else:
        rows_blk = _ROWS_MAX
        d = _ROWS_MAX
        while d >= _ROWS_MAX // 4:
            if rows_total % d == 0:
                rows_blk = d
                break
            d -= 8
    n_tiles = -(-rows_total // rows_blk)
    needs_row_mask = (rows_total % rows_blk) != 0

    # Balanced megacore split over batch halves (v7x); no-op loop on v5e/v6e.
    n_split = 2 if (N >= 2 and N % 2 == 0) else 1
    n_per_split = N // n_split

    kernel = functools.partial(
        _bce_dice_stats_kernel,
        rows_total=rows_total, rows_blk=rows_blk, needs_row_mask=needs_row_mask)

    # Double-buffered input blocks + margin; clamp so it fits v5e/v6e/v7x VMEM.
    blk_bytes = _C_USED * rows_blk * _LANE * (p4.dtype.itemsize + y4.dtype.itemsize)
    vmem_limit = int(min(48 << 20, max(16 << 20, 2 * blk_bytes + (8 << 20))))

    stats = pl.pallas_call(
        kernel,
        out_shape=jax.ShapeDtypeStruct((n_split, 4, _C_USED, _LANE), jnp.float32),
        grid_spec=pltpu.PrefetchScalarGridSpec(
            num_scalar_prefetch=0,
            grid=(n_split, n_per_split, n_tiles),
            in_specs=[
                pl.BlockSpec((1, _C_USED, rows_blk, _LANE),
                             lambda s, n, t: (s * n_per_split + n, 0, t, 0)),
                pl.BlockSpec((1, _C_USED, rows_blk, _LANE),
                             lambda s, n, t: (s * n_per_split + n, 0, t, 0)),
            ],
            out_specs=pl.BlockSpec((1, 4, _C_USED, _LANE),
                                   lambda s, n, t: (s, 0, 0, 0)),
            scratch_shapes=[pltpu.VMEM((4, _C_USED, _LANE), jnp.float32)],
        ),
        compiler_params=pltpu.CompilerParams(
            dimension_semantics=("parallel", "arbitrary", "arbitrary"),
            vmem_limit_bytes=vmem_limit),
    )(p4, y4)

    # Tiny final reductions / scalar math in plain JAX.
    s = jnp.sum(stats, axis=(0, 3))                     # (4, C_USED)
    inter, psum, ysum, bsum = s[0], s[1], s[2], s[3]
    dice = 1.0 - (2.0 * inter + _DICE_SMOOTH) / (psum + ysum + _DICE_SMOOTH)
    bce = bsum / jnp.float32(M)                         # per-channel BCE mean
    return jnp.sum(dice + bce)


def _reference_loss(p, y):
    """Pure-JAX reference of the same semantics, for a sanity check."""
    p = p.astype(jnp.float32)
    y = y.astype(jnp.float32)
    total = 0.0
    for c in range(_C_USED):
        pc = p[:, c]
        yc = y[:, c]
        sp = jax.nn.sigmoid(pc)
        inter = jnp.sum(sp * yc)
        dice = 1.0 - (2.0 * inter + _DICE_SMOOTH) / (jnp.sum(sp) + jnp.sum(yc) + _DICE_SMOOTH)
        bce = jnp.mean(jnp.maximum(pc, 0.0) - pc * yc + jnp.log1p(jnp.exp(-jnp.abs(pc))))
        total = total + dice + bce
    return total


if __name__ == "__main__":
    key = jax.random.PRNGKey(0)
    kp, ky = jax.random.split(key)
    N, C, H, W = 2, 3, 16, 16  # NCHW, 3 channels as the module's forward implies
    p = jax.random.normal(kp, (N, C, H, W), dtype=jnp.float32)            # logits
    y = (jax.random.uniform(ky, (N, C, H, W)) > 0.5).astype(jnp.float32)  # binary targets

    loss = jax.jit(bce_dice_loss)(p, y)
    loss = jax.block_until_ready(loss)

    ref = _reference_loss(p, y)
    assert jnp.allclose(loss, ref, rtol=1e-3, atol=1e-3), (loss, ref)

    print("KERNEL_OK")
</pallas_src>

<mosaic_0001>
module attributes {stable_mosaic.version = 11 : i64} {
  func.func @_bce_dice_stats_kernel(%arg0: i32, %arg1: i32, %arg2: i32, %arg3: memref<1x3x2x128xf32, #tpu.memory_space<vmem>>, %arg4: memref<1x3x2x128xf32, #tpu.memory_space<vmem>>, %arg5: memref<1x4x3x128xf32, #tpu.memory_space<vmem>>, %arg6: memref<4x3x128xf32, #tpu.memory_space<vmem>>) attributes {dimension_semantics = [#tpu.dimension_semantics<parallel>, #tpu.dimension_semantics<arbitrary>, #tpu.dimension_semantics<arbitrary>], iteration_bounds = array<i64: 2, 1, 1>, scalar_prefetch = 0 : i64, scratch_operands = 1 : i64, tpu.core_type = #tpu.core_type<tc>, window_params = [{transform_indices = @transform_0, window_bounds = array<i64: 1, 3, 2, 128>}, {transform_indices = @transform_1, window_bounds = array<i64: 1, 3, 2, 128>}, {transform_indices = @transform_2, window_bounds = array<i64: 1, 4, 3, 128>}]} {
    %c0_i32 = arith.constant 0 : i32
    %0 = arith.cmpi eq, %arg1, %c0_i32 : i32
    %c0_i32_0 = arith.constant 0 : i32
    %1 = arith.cmpi eq, %arg2, %c0_i32_0 : i32
    %2 = arith.andi %0, %1 : i1
    %3 = arith.extui %2 : i1 to i32
    %c0_i32_1 = arith.constant 0 : i32
    %4 = arith.cmpi ne, %3, %c0_i32_1 : i32
    scf.if %4 {
      %cst_42 = arith.constant 0.000000e+00 : f32
      %61 = vector.broadcast %cst_42 : f32 to vector<4x3x128xf32>
      %c0_43 = arith.constant 0 : index
      %c0_44 = arith.constant 0 : index
      %c0_45 = arith.constant 0 : index
      %62 = vector.load %arg6[%c0_43, %c0_44, %c0_45] : memref<4x3x128xf32, #tpu.memory_space<vmem>>, vector<4x3x128xf32>
      tpu.vector_store %arg6[%c0_43, %c0_44, %c0_45], %61 {strides = array<i32>} : memref<4x3x128xf32, #tpu.memory_space<vmem>>, vector<4x3x128xf32>,
    } else {
    }
    %c0 = arith.constant 0 : index
    %c0_2 = arith.constant 0 : index
    %c0_3 = arith.constant 0 : index
    %c0_4 = arith.constant 0 : index
    %5 = vector.load %arg3[%c0, %c0_2, %c0_3, %c0_4] : memref<1x3x2x128xf32, #tpu.memory_space<vmem>>, vector<1x3x2x128xf32>
    %6 = vector.shape_cast %5 : vector<1x3x2x128xf32> to vector<3x2x128xf32>
    %c0_5 = arith.constant 0 : index
    %c0_6 = arith.constant 0 : index
    %c0_7 = arith.constant 0 : index
    %c0_8 = arith.constant 0 : index
    %7 = vector.load %arg4[%c0_5, %c0_6, %c0_7, %c0_8] : memref<1x3x2x128xf32, #tpu.memory_space<vmem>>, vector<1x3x2x128xf32>
    %8 = vector.shape_cast %7 : vector<1x3x2x128xf32> to vector<3x2x128xf32>
    %cst = arith.constant 5.000000e-01 : f32
    %9 = vector.broadcast %cst : f32 to vector<3x2x128xf32>
    %10 = arith.mulf %9, %6 : vector<3x2x128xf32>
    %11 = math.tanh %10 : vector<3x2x128xf32>
    %cst_9 = arith.constant 5.000000e-01 : f32
    %12 = vector.broadcast %cst_9 : f32 to vector<3x2x128xf32>
    %13 = arith.mulf %12, %11 : vector<3x2x128xf32>
    %cst_10 = arith.constant 5.000000e-01 : f32
    %14 = vector.broadcast %cst_10 : f32 to vector<3x2x128xf32>
    %15 = arith.addf %14, %13 : vector<3x2x128xf32>
    %cst_11 = arith.constant 0.000000e+00 : f32
    %16 = vector.broadcast %cst_11 : f32 to vector<3x2x128xf32>
    %17 = arith.maximumf %6, %16 : vector<3x2x128xf32>
    %18 = arith.mulf %6, %8 : vector<3x2x128xf32>
    %19 = arith.subf %17, %18 : vector<3x2x128xf32>
    %20 = math.absf %11 : vector<3x2x128xf32>
    %cst_12 = arith.constant 5.000000e-01 : f32
    %21 = vector.broadcast %cst_12 : f32 to vector<3x2x128xf32>
    %22 = arith.mulf %21, %20 : vector<3x2x128xf32>
    %cst_13 = arith.constant 5.000000e-01 : f32
    %23 = vector.broadcast %cst_13 : f32 to vector<3x2x128xf32>
    %24 = arith.addf %23, %22 : vector<3x2x128xf32>
    %25 = math.log %24 : vector<3x2x128xf32>
    %26 = arith.subf %19, %25 : vector<3x2x128xf32>
    %c0_14 = arith.constant 0 : index
    %c0_15 = arith.constant 0 : index
    %c0_16 = arith.constant 0 : index
    %27 = vector.load %arg6[%c0_14, %c0_15, %c0_16] : memref<4x3x128xf32, #tpu.memory_space<vmem>>, vector<1x3x128xf32>
    %28 = vector.shape_cast %27 : vector<1x3x128xf32> to vector<3x128xf32>
    %29 = arith.mulf %15, %8 : vector<3x2x128xf32>
    %cst_17 = arith.constant dense<0.000000e+00> : vector<3x128xf32>
    %30 = vector.multi_reduction <add>, %29, %cst_17 [1] : vector<3x2x128xf32> to vector<3x128xf32>
    %31 = arith.addf %28, %30 : vector<3x128xf32>
    %c0_18 = arith.constant 0 : index
    %c0_19 = arith.constant 0 : index
    %c0_20 = arith.constant 0 : index
    %32 = vector.load %arg6[%c0_18, %c0_19, %c0_20] : memref<4x3x128xf32, #tpu.memory_space<vmem>>, vector<1x3x128xf32>
    %33 = vector.shape_cast %32 : vector<1x3x128xf32> to vector<3x128xf32>
    %34 = vector.shape_cast %31 : vector<3x128xf32> to vector<1x3x128xf32>
    tpu.vector_store %arg6[%c0_18, %c0_19, %c0_20], %34 {strides = array<i32>} : memref<4x3x128xf32, #tpu.memory_space<vmem>>, vector<1x3x128xf32>,
    %c1 = arith.constant 1 : index
    %c0_21 = arith.constant 0 : index
    %c0_22 = arith.constant 0 : index
    %35 = vector.load %arg6[%c1, %c0_21, %c0_22] : memref<4x3x128xf32, #tpu.memory_space<vmem>>, vector<1x3x128xf32>
    %36 = vector.shape_cast %35 : vector<1x3x128xf32> to vector<3x128xf32>
    %cst_23 = arith.constant dense<0.000000e+00> : vector<3x128xf32>
    %37 = vector.multi_reduction <add>, %15, %cst_23 [1] : vector<3x2x128xf32> to vector<3x128xf32>
    %38 = arith.addf %36, %37 : vector<3x128xf32>
    %c1_24 = arith.constant 1 : index
    %c0_25 = arith.constant 0 : index
    %c0_26 = arith.constant 0 : index
    %39 = vector.load %arg6[%c1_24, %c0_25, %c0_26] : memref<4x3x128xf32, #tpu.memory_space<vmem>>, vector<1x3x128xf32>
    %40 = vector.shape_cast %39 : vector<1x3x128xf32> to vector<3x128xf32>
    %41 = vector.shape_cast %38 : vector<3x128xf32> to vector<1x3x128xf32>
    tpu.vector_store %arg6[%c1_24, %c0_25, %c0_26], %41 {strides = array<i32>} : memref<4x3x128xf32, #tpu.memory_space<vmem>>, vector<1x3x128xf32>,
    %c2 = arith.constant 2 : index
    %c0_27 = arith.constant 0 : index
    %c0_28 = arith.constant 0 : index
    %42 = vector.load %arg6[%c2, %c0_27, %c0_28] : memref<4x3x128xf32, #tpu.memory_space<vmem>>, vector<1x3x128xf32>
    %43 = vector.shape_cast %42 : vector<1x3x128xf32> to vector<3x128xf32>
    %cst_29 = arith.constant dense<0.000000e+00> : vector<3x128xf32>
    %44 = vector.multi_reduction <add>, %8, %cst_29 [1] : vector<3x2x128xf32> to vector<3x128xf32>
    %45 = arith.addf %43, %44 : vector<3x128xf32>
    %c2_30 = arith.constant 2 : index
    %c0_31 = arith.constant 0 : index
    %c0_32 = arith.constant 0 : index
    %46 = vector.load %arg6[%c2_30, %c0_31, %c0_32] : memref<4x3x128xf32, #tpu.memory_space<vmem>>, vector<1x3x128xf32>
    %47 = vector.shape_cast %46 : vector<1x3x128xf32> to vector<3x128xf32>
    %48 = vector.shape_cast %45 : vector<3x128xf32> to vector<1x3x128xf32>
    tpu.vector_store %arg6[%c2_30, %c0_31, %c0_32], %48 {strides = array<i32>} : memref<4x3x128xf32, #tpu.memory_space<vmem>>, vector<1x3x128xf32>,
    %c3 = arith.constant 3 : index
    %c0_33 = arith.constant 0 : index
    %c0_34 = arith.constant 0 : index
    %49 = vector.load %arg6[%c3, %c0_33, %c0_34] : memref<4x3x128xf32, #tpu.memory_space<vmem>>, vector<1x3x128xf32>
    %50 = vector.shape_cast %49 : vector<1x3x128xf32> to vector<3x128xf32>
    %cst_35 = arith.constant dense<0.000000e+00> : vector<3x128xf32>
    %51 = vector.multi_reduction <add>, %26, %cst_35 [1] : vector<3x2x128xf32> to vector<3x128xf32>
    %52 = arith.addf %50, %51 : vector<3x128xf32>
    %c3_36 = arith.constant 3 : index
    %c0_37 = arith.constant 0 : index
    %c0_38 = arith.constant 0 : index
    %53 = vector.load %arg6[%c3_36, %c0_37, %c0_38] : memref<4x3x128xf32, #tpu.memory_space<vmem>>, vector<1x3x128xf32>
    %54 = vector.shape_cast %53 : vector<1x3x128xf32> to vector<3x128xf32>
    %55 = vector.shape_cast %52 : vector<3x128xf32> to vector<1x3x128xf32>
    tpu.vector_store %arg6[%c3_36, %c0_37, %c0_38], %55 {strides = array<i32>} : memref<4x3x128xf32, #tpu.memory_space<vmem>>, vector<1x3x128xf32>,
    %c0_i32_39 = arith.constant 0 : i32
    %56 = arith.cmpi eq, %arg1, %c0_i32_39 : i32
    %c0_i32_40 = arith.constant 0 : i32
    %57 = arith.cmpi eq, %arg2, %c0_i32_40 : i32
    %58 = arith.andi %56, %57 : i1
    %59 = arith.extui %58 : i1 to i32
    %c0_i32_41 = arith.constant 0 : i32
    %60 = arith.cmpi ne, %59, %c0_i32_41 : i32
    scf.if %60 {
      %c0_42 = arith.constant 0 : index
      %c0_43 = arith.constant 0 : index
      %c0_44 = arith.constant 0 : index
      %61 = vector.load %arg6[%c0_42, %c0_43, %c0_44] : memref<4x3x128xf32, #tpu.memory_space<vmem>>, vector<4x3x128xf32>
      %c0_45 = arith.constant 0 : index
      %c0_46 = arith.constant 0 : index
      %c0_47 = arith.constant 0 : index
      %c0_48 = arith.constant 0 : index
      %62 = vector.load %arg5[%c0_45, %c0_46, %c0_47, %c0_48] : memref<1x4x3x128xf32, #tpu.memory_space<vmem>>, vector<1x4x3x128xf32>
      %63 = vector.shape_cast %62 : vector<1x4x3x128xf32> to vector<4x3x128xf32>
      %64 = vector.shape_cast %61 : vector<4x3x128xf32> to vector<1x4x3x128xf32>
      tpu.vector_store %arg5[%c0_45, %c0_46, %c0_47, %c0_48], %64 {strides = array<i32>} : memref<1x4x3x128xf32, #tpu.memory_space<vmem>>, vector<1x4x3x128xf32>,
    } else {
    }
    return
  }
  func.func @transform_0(%arg0: i32, %arg1: i32, %arg2: i32) -> (i32, i32, i32, i32) {
    %c1_i32 = arith.constant 1 : i32
    %0 = arith.muli %arg0, %c1_i32 : i32
    %1 = arith.addi %0, %arg1 : i32
    %c0_i32 = arith.constant 0 : i32
    %c0_i32_0 = arith.constant 0 : i32
    %c0_i32_1 = arith.constant 0 : i32
    return %1, %c0_i32, %arg2, %c0_i32_0 : i32, i32, i32, i32
  }
  func.func @transform_1(%arg0: i32, %arg1: i32, %arg2: i32) -> (i32, i32, i32, i32) {
    %c1_i32 = arith.constant 1 : i32
    %0 = arith.muli %arg0, %c1_i32 : i32
    %1 = arith.addi %0, %arg1 : i32
    %c0_i32 = arith.constant 0 : i32
    %c0_i32_0 = arith.constant 0 : i32
    %c0_i32_1 = arith.constant 0 : i32
    return %1, %c0_i32, %arg2, %c0_i32_0 : i32, i32, i32, i32
  }
  func.func @transform_2(%arg0: i32, %arg1: i32, %arg2: i32) -> (i32, i32, i32, i32) {
    %c0_i32 = arith.constant 0 : i32
    %c0_i32_0 = arith.constant 0 : i32
    %c0_i32_1 = arith.constant 0 : i32
    %c0_i32_2 = arith.constant 0 : i32
    return %arg0, %c0_i32, %c0_i32_0, %c0_i32_1 : i32, i32, i32, i32
  }
}

</mosaic_0001>

<bundles_post_ra>
// kernel: bce_dice_loss.1
= control target key start
LH: loop header
LB: loop body
LE: loop exit
PB: predicated region body
PF: predicated region fallthrough
CT: control target
= control target key end

     0   :  { %s593_s9 = smov 0   ;;  %s595_s10 = smov 0   ;;  %s689_s0 = inlined_call_operand.vmem [shape: f32[2,3,2,128], index: 0, kind: input, shape index: {}]   ;;  %s690_s1 = inlined_call_operand.vmem [shape: f32[2,3,2,128], index: 1, kind: input, shape index: {}]   ;;  %s691_s2 = inlined_call_operand.vmem [shape: f32[2,4,3,128], index: 2, kind: output, shape index: {}]  }
   0x1   :  { %s597_s11 = smov 0  }
   0x2 LB: > { %s31_s12 = sadd.s32 1, %s571_s10  ;;  %p507_p0 = scmp.ge.s32.totalorder %s575_s11, 1  ;;  %s575_s11 = sphi %s597_s11, %s12_s11   ;;  %s571_s10 = sphi %s595_s10, %s693_s10   ;;  %s567_s9 = sphi %s593_s9, %s692_s9  }
   0x3   : > { %p33_p1 = scmp.ge.s32.totalorder %s31_s12, 2  ;;  %p159_p2 = scmp.lt.s32.totalorder %s575_s11, 3 }
   0x5   : > { %s695_s12 = smov (%p33_p1, %s31_s12), 0  ;;  %p160_p3 = pnand %p507_p0, %p159_p2 }
   0x6   : > { %p195_p4 = scmp.lt.s32.totalorder (!%p160_p3), %s567_s9, 1  ;;  %v577_v0 = vmov (!%p160_p3), 0.0   ;;  %vm278_vm0 = vcmask (!%p160_p3), 1041408   ;;  %vm303_vm1 = vcmask (!%p160_p3), 1041409   ;;  %vm305_vm2 = vcmask (!%p160_p3), 1042434  }
   0x7   : > { %163 = sbr.rel (%p160_p3) target bundleno = 86 (0x56), region = 28  ;;  %225 = vst [vmem:[#allocation2] sm:$0x7] (!%p160_p3), %v577_v0  ;;  %226 = vst [vmem:[#allocation2 + $0x4] sm:$0x7] (!%p160_p3), %v577_v0 }
   0x8   : > { %227 = vst [vmem:[#allocation2 + $0x8] sm:$0x7] (!%p160_p3), %v577_v0  ;;  %228 = vst [vmem:[#allocation2 + $0xc] sm:$0x7] (!%p160_p3), %v577_v0 }
   0xe   : > { %s697_s9 = smov (!%p195_p4, %s567_s9), 1 }
   0xf   : > { %s515_s13 = smul.u32 6, %s697_s9  ;;  %v342_v33 = vld [vmem:[#allocation2 + $0x8] sm:$0x7]  ;;  %s514_s20 = sshll.u32 %s697_s9, 4 }
  0x10   : > { %s656_s23 = scalar_lea.vmem %s691_s2, %s514_s20 }
  0x11   : > { %s202_s16 = scalar_lea.vmem %s689_s0, %s515_s13  ;;  %s212_s19 = scalar_lea.vmem %s690_s1, %s515_s13 }
  0x12   : > { %v620_v1 = vld [vmem:[%s202_s16] sm:$0x3]  ;;  %v622_v2 = vld [vmem:[%s202_s16 + $0x2] sm:$0x3]  ;;  %v624_v3 = vld [vmem:[%s202_s16 + $0x4] sm:$0x3] }
  0x13   : > { %v626_v4 = vld [vmem:[%s212_s19] sm:$0x3]  ;;  %v628_v5 = vld [vmem:[%s212_s19 + $0x2] sm:$0x3]  ;;  %v235_v6 = vmul.f32 0.5, %v620_v1  ;;  %v236_v7 = vmul.f32 0.5, %v622_v2 }
  0x14   : > { %v237_v8 = vmul.f32 0.5, %v624_v3  ;;  %v343_v9 = vsel %vm278_vm0, %v626_v4, 0.0  ;;  %v635_v10 = vld [vmem:[%s212_s19 + $0x4] sm:$0x3]  ;;  %v350_v12 = vsel %vm278_vm0, %v628_v5, 0.0 }
  0x15   : > { %v344_v11 = vrot.slane %v343_v9, 4  ;;  %541 = vtanh.f32 %v235_v6  ;;  %v351_v13 = vrot.slane %v350_v12, 4  ;;  %v357_v14 = vsel %vm278_vm0, %v635_v10, 0.0 }
  0x16   : > { %543 = vtanh.f32 %v236_v7  ;;  %v358_v16 = vrot.slane %v357_v14, 4 }
  0x17   : > { %v345_v15 = vadd.f32 %v344_v11, %v343_v9  ;;  %545 = vtanh.f32 %v237_v8  ;;  %v352_v17 = vadd.f32 %v351_v13, %v350_v12 }
  0x18   : > { %v359_v19 = vadd.f32 %v358_v16, %v357_v14 }
  0x19   : > { %v346_v18 = vrot.slane %v345_v15, 2  ;;  %v353_v20 = vrot.slane %v352_v17, 2 }
  0x1a   : > { %v360_v22 = vrot.slane %v359_v19, 2 }
  0x1b   : > { %v347_v21 = vadd.f32 %v346_v18, %v345_v15  ;;  %v354_v23 = vadd.f32 %v353_v20, %v352_v17 }
  0x1c   : > { %v361_v25 = vadd.f32 %v360_v22, %v359_v19 }
  0x1d   : > { %v348_v24 = vrot.slane %v347_v21, 1  ;;  %v355_v26 = vrot.slane %v354_v23, 1 }
  0x1e   : > { %v362_v28 = vrot.slane %v361_v25, 1 }
  0x1f   : > { %v349_v27 = vadd.f32 %v348_v24, %v347_v21  ;;  %v542_v29 = vpop.eup %541  ;;  %v356_v30 = vadd.f32 %v355_v26, %v354_v23  ;;  %v250_v23 = vmul.f32 %v626_v4, %v620_v1 }
  0x20   : > { %v544_v31 = vpop.eup %543  ;;  %v241_v32 = vmul.f32 0.5, %v542_v29  ;;  %v363_v34 = vadd.f32 %v362_v28, %v361_v25  ;;  %v256_v35 = vand.u32 2147483647, %v542_v29 }
  0x21   : > { %v546_v36 = vpop.eup %545  ;;  %v242_v37 = vmul.f32 0.5, %v544_v31  ;;  %v367_v38 = vsel %vm303_vm1, %v356_v30, %v349_v27  ;;  %v257_v39 = vand.u32 2147483647, %v544_v31  ;;  %v247_v31 = vmax.f32 %v620_v1, 0.0 }
  0x22   : > { %v243_v40 = vmul.f32 0.5, %v546_v36  ;;  %v244_v41 = vadd.f32 0.5, %v241_v32  ;;  %v368_v42 = vsel %vm305_vm2, %v363_v34, %v367_v38  ;;  %v258_v43 = vand.u32 2147483647, %v546_v36 }
  0x23   : > { %v245_v44 = vadd.f32 0.5, %v242_v37  ;;  %v370_v45 = vadd.f32 %v368_v42, %v342_v33  ;;  %v259_v46 = vmul.f32 0.5, %v256_v35  ;;  %v260_v47 = vmul.f32 0.5, %v257_v39 }
  0x24   : > { %v246_v48 = vadd.f32 0.5, %v243_v40  ;;  %v275_v49 = vmul.f32 %v244_v41, %v626_v4  ;;  %v312_v50 = vsel %vm278_vm0, %v244_v41, 0.0  ;;  %v261_v51 = vmul.f32 0.5, %v258_v43  ;;  %v311_v40 = vld [vmem:[#allocation2 + $0x4] sm:$0x7] }
  0x25   : > { %v276_v52 = vmul.f32 %v245_v44, %v628_v5  ;;  %v313_v53 = vrot.slane %v312_v50, 4  ;;  %v319_v54 = vsel %vm278_vm0, %v245_v44, 0.0  ;;  %371 = vst [vmem:[#allocation2 + $0x8] sm:$0x7] %v370_v45  ;;  %v262_v55 = vadd.f32 0.5, %v259_v46 }
  0x26   : > { %v277_v56 = vmul.f32 %v246_v48, %v635_v10  ;;  %v279_v57 = vsel %vm278_vm0, %v275_v49, 0.0  ;;  %v320_v58 = vrot.slane %v319_v54, 4  ;;  %v326_v59 = vsel %vm278_vm0, %v246_v48, 0.0  ;;  %v274_v45 = vld [vmem:[#allocation2] sm:$0x7] }
  0x27   : > { %v280_v60 = vrot.slane %v279_v57, 4  ;;  %v286_v61 = vsel %vm278_vm0, %v276_v52, 0.0  ;;  %v314_v62 = vadd.f32 %v313_v53, %v312_v50  ;;  %v327_v63 = vrot.slane %v326_v59, 4 }
  0x28   : > { %v287_v0 = vrot.slane %v286_v61, 4  ;;  %v293_v6 = vsel %vm278_vm0, %v277_v56, 0.0  ;;  %v321_v7 = vadd.f32 %v320_v58, %v319_v54  ;;  %v263_v8 = vadd.f32 0.5, %v260_v47 }
  0x29   : > { %v281_v9 = vadd.f32 %v280_v60, %v279_v57  ;;  %v294_v11 = vrot.slane %v293_v6, 4  ;;  %v315_v12 = vrot.slane %v314_v62, 2  ;;  %v328_v13 = vadd.f32 %v327_v63, %v326_v59 }
  0x2a   : > { %v288_v14 = vadd.f32 %v287_v0, %v286_v61  ;;  %v322_v15 = vrot.slane %v321_v7, 2  ;;  %v264_v16 = vadd.f32 0.5, %v261_v51  ;;  %547 = vlog2.f32 %v262_v55 }
  0x2b   : > { %v282_v17 = vrot.slane %v281_v9, 2  ;;  %v295_v18 = vadd.f32 %v294_v11, %v293_v6  ;;  %v316_v19 = vadd.f32 %v315_v12, %v314_v62  ;;  %v329_v20 = vrot.slane %v328_v13, 2 }
  0x2c   : > { %v289_v21 = vrot.slane %v288_v14, 2  ;;  %v323_v22 = vadd.f32 %v322_v15, %v321_v7  ;;  %549 = vlog2.f32 %v263_v8  ;;  %v407_v24 = vld [vmem:[#allocation2 + $0x8] sm:$0x7]  ;;  %v251_v4 = vmul.f32 %v628_v5, %v622_v2 }
  0x2d   : > { %v283_v25 = vadd.f32 %v282_v17, %v281_v9  ;;  %v296_v26 = vrot.slane %v295_v18, 2  ;;  %v317_v27 = vrot.slane %v316_v19, 1  ;;  %v330_v28 = vadd.f32 %v329_v20, %v328_v13  ;;  %411 = vst [vmem:[%s656_s23 + $0x8] sm:$0x7] %v407_v24 }
  0x2e   : > { %v290_v29 = vadd.f32 %v289_v21, %v288_v14  ;;  %v324_v30 = vrot.slane %v323_v22, 1  ;;  %551 = vlog2.f32 %v264_v16  ;;  %v248_v42 = vmax.f32 %v622_v2, 0.0 }
  0x2f   : > { %v284_v32 = vrot.slane %v283_v25, 1  ;;  %v297_v33 = vadd.f32 %v296_v26, %v295_v18  ;;  %v318_v34 = vadd.f32 %v317_v27, %v316_v19  ;;  %v331_v35 = vrot.slane %v330_v28, 1 }
  0x30   : > { %v291_v36 = vrot.slane %v290_v29, 1  ;;  %v325_v37 = vadd.f32 %v324_v30, %v323_v22  ;;  %v249_v1 = vmax.f32 %v624_v3, 0.0  ;;  %v252_v48 = vmul.f32 %v635_v10, %v624_v3 }
  0x31   : > { %v285_v38 = vadd.f32 %v284_v32, %v283_v25  ;;  %v298_v39 = vrot.slane %v297_v33, 1  ;;  %v332_v41 = vadd.f32 %v331_v35, %v330_v28  ;;  %v253_v49 = vsub.f32 %v247_v31, %v250_v23  ;;  %v373_v25 = vld [vmem:[#allocation2 + $0xc] sm:$0x7] }
  0x32   : > { %v292_v43 = vadd.f32 %v291_v36, %v290_v29  ;;  %v336_v44 = vsel %vm303_vm1, %v325_v37, %v318_v34  ;;  %v254_v2 = vsub.f32 %v248_v42, %v251_v4  ;;  %v255_v56 = vsub.f32 %v249_v1, %v252_v48 }
  0x33   : > { %v299_v46 = vadd.f32 %v298_v39, %v297_v33  ;;  %v337_v47 = vsel %vm305_vm2, %v332_v41, %v336_v44 }
  0x34   : > { %v548_v5 = vpop.eup %547  ;;  %v304_v50 = vsel %vm303_vm1, %v292_v43, %v285_v38  ;;  %v339_v51 = vadd.f32 %v337_v47, %v311_v40 }
  0x35   : > { %v306_v52 = vsel %vm305_vm2, %v299_v46, %v304_v50  ;;  %v266_v53 = vmul.f32 0.6931472, %v548_v5 }
  0x36   : > { %v550_v54 = vpop.eup %549  ;;  %v308_v55 = vadd.f32 %v306_v52, %v274_v45  ;;  %340 = vst [vmem:[#allocation2 + $0x4] sm:$0x7] %v339_v51 }
  0x37   : > { %v268_v57 = vmul.f32 0.6931472, %v550_v54  ;;  %v271_v58 = vsub.f32 %v253_v49, %v266_v53 }
  0x38   : > { %v552_v59 = vpop.eup %551  ;;  %309 = vst [vmem:[#allocation2] sm:$0x7] %v308_v55 }
  0x39   : > { %v270_v60 = vmul.f32 0.6931472, %v552_v59  ;;  %v272_v3 = vsub.f32 %v254_v2, %v268_v57  ;;  %v374_v10 = vsel %vm278_vm0, %v271_v58, 0.0 }
  0x3a   : > { %v375_v61 = vrot.slane %v374_v10, 4 }
  0x3b   : > { %v273_v62 = vsub.f32 %v255_v56, %v270_v60  ;;  %v381_v63 = vsel %vm278_vm0, %v272_v3, 0.0 }
  0x3c   : > { %v376_v0 = vadd.f32 %v375_v61, %v374_v10  ;;  %v382_v6 = vrot.slane %v381_v63, 4 }
  0x3d   : > { %v388_v7 = vsel %vm278_vm0, %v273_v62, 0.0  ;;  %v406_v8 = vld [vmem:[#allocation2 + $0x4] sm:$0x7] }
  0x3e   : > { %v377_v9 = vrot.slane %v376_v0, 2  ;;  %v383_v11 = vadd.f32 %v382_v6, %v381_v63  ;;  %v389_v12 = vrot.slane %v388_v7, 4  ;;  %410 = vst [vmem:[%s656_s23 + $0x4] sm:$0x7] %v406_v8 }
  0x3f   : > { %v405_v13 = vld [vmem:[#allocation2] sm:$0x7] }
  0x40   : > { %v378_v14 = vadd.f32 %v377_v9, %v376_v0  ;;  %v384_v15 = vrot.slane %v383_v11, 2  ;;  %v390_v16 = vadd.f32 %v389_v12, %v388_v7  ;;  %409 = vst [vmem:[%s656_s23] sm:$0x7] %v405_v13 }
  0x42   : > { %v379_v17 = vrot.slane %v378_v14, 1  ;;  %v385_v18 = vadd.f32 %v384_v15, %v383_v11  ;;  %v391_v19 = vrot.slane %v390_v16, 2 }
  0x44   : > { %v380_v20 = vadd.f32 %v379_v17, %v378_v14  ;;  %v386_v21 = vrot.slane %v385_v18, 1  ;;  %v392_v22 = vadd.f32 %v391_v19, %v390_v16 }
  0x46   : > { %v387_v23 = vadd.f32 %v386_v21, %v385_v18  ;;  %v393_v24 = vrot.slane %v392_v22, 1 }
  0x48   : > { %v394_v26 = vadd.f32 %v393_v24, %v392_v22  ;;  %v398_v27 = vsel %vm303_vm1, %v387_v23, %v380_v20 }
  0x4a   : > { %v399_v28 = vsel %vm305_vm2, %v394_v26, %v398_v27 }
  0x4b   : > { %v401_v29 = vadd.f32 %v399_v28, %v373_v25 }
  0x4d   : > { %402 = vst [vmem:[#allocation2 + $0xc] sm:$0x7] %v401_v29 }
  0x54   : > { %v408_v30 = vld [vmem:[#allocation2 + $0xc] sm:$0x7] }
  0x55   : > { %412 = vst [vmem:[%s656_s23 + $0xc] sm:$0x7] %v408_v30 }
  0x56 PF: > { %s12_s11 = sadd.s32 1, %s575_s11   ;;  %s692_s9 = smov %s571_s10 }
  0x57   : > { %p9_p5 = scmp.ge.s32.totalorder %s12_s11, 4   ;;  %s693_s10 = smov %s695_s12 }
  0x59   :  { %11 = sbr.rel (!%p9_p5) target bundleno = 2 (0x2), region = 72 }

</bundles_post_ra>
